<compile_context>
chip_gen: v6e
topology: v6e:2x2x1
jax: 0.10.0
libtpu: 0.0.40
codegen_flags: <defaults>
</compile_context>

<pallas_src>
import math

import jax
import jax.numpy as jnp
from jax.experimental import pallas as pl
from jax.experimental.pallas import tpu as pltpu

_MIB = 1024 * 1024


def make_positional_encoding(d_model: int, max_len: int = 5000,
                             dtype=jnp.float32) -> jnp.ndarray:
    """Deterministic buffer init, identical to the PyTorch __init__.

    Build it once in the *model* dtype so the forward path never pays a
    per-call slice/convert XLA op.
    """
    position = jnp.arange(0, max_len, dtype=jnp.float32)[:, None]           # (L, 1)
    div_term = jnp.exp(
        jnp.arange(0, d_model, 2, dtype=jnp.float32)
        * -(math.log(10000.0) / d_model))                                    # (ceil(D/2),)
    angles = position * div_term                                             # (L, ceil(D/2))
    pe = jnp.zeros((max_len, d_model), dtype=jnp.float32)
    pe = pe.at[:, 0::2].set(jnp.sin(angles))
    # Guard for odd d_model: the cos half has floor(D/2) columns.
    pe = pe.at[:, 1::2].set(jnp.cos(angles[:, : d_model // 2]))
    return pe.astype(dtype)                                                  # (L, D)


def _pe_add_kernel(x_ref, pe_ref, o_ref):
    # Batch dim squeezed out by the BlockSpec -> all refs are (tS, D).
    # One vld + vld + vadd + vst per vreg; no broadcast_in_dim needed.
    o_ref[...] = (x_ref[...] + pe_ref[...]).astype(o_ref.dtype)


def _tpu_vmem_bytes() -> int:
    """Physical VMEM capacity (trace-time query); conservative fallback."""
    try:
        return int(pltpu.get_tpu_info().vmem_capacity_bytes)
    except Exception:
        return 64 * _MIB  # assume the smallest (v7x) if the query is unavailable


def _choose_seq_tile(S: int, D: int, B: int, itemsize: int,
                     vmem_bytes: int) -> int:
    """Sequence-tile size for one (tS, D) block.

    ~4 MiB blocks on 128 MiB-VMEM chips (v5e/v6e), ~2 MiB on v7x (64 MiB),
    rounded to a sublane multiple (8 f32 / 16 bf16 / 32 int8).  When B == 1
    the sequence axis is split into >=2 tiles (when possible) so v7x's two
    TensorCores both get work.
    """
    sub = {4: 8, 2: 16, 1: 32}.get(itemsize, 8)
    if S < sub:
        return S                                   # full-S block (pe gets sliced)
    target = (4 if vmem_bytes >= 100 * _MIB else 2) * _MIB
    row_bytes = max(1, D * itemsize)
    tS = max(sub, (target // row_bytes) // sub * sub)
    tS = min(tS, max(sub, (S // sub) * sub))
    # v7x megacore: with B == 1, ensure >=2 parallel grid steps along seq.
    if B == 1 and tS >= S and S >= 2 * sub:
        tS = (((S + 1) // 2) + sub - 1) // sub * sub
    return tS


def positional_encoding_forward(x: jnp.ndarray, pe: jnp.ndarray) -> jnp.ndarray:
    """x: (B, S, D); pe: (max_len, D). Returns x + pe[:S] broadcast over batch."""
    B, S, D = x.shape
    max_len, d_model = pe.shape
    if d_model != D:
        raise ValueError(f"d_model mismatch: x has D={D}, pe has D={d_model}")
    if S > max_len:
        raise ValueError(f"sequence length {S} exceeds max_len {max_len}")
    if pe.dtype != x.dtype:
        # Should be hoisted to init (make_positional_encoding(..., dtype=x.dtype));
        # kept only as a safety net so the kernel never sees mixed dtypes.
        pe = pe.astype(x.dtype)

    itemsize = jnp.dtype(x.dtype).itemsize
    sub = {4: 8, 2: 16, 1: 32}.get(itemsize, 8)
    vmem_bytes = _tpu_vmem_bytes()
    tS = _choose_seq_tile(S, D, B, itemsize, vmem_bytes)

    if tS % sub != 0:
        # Ragged S smaller than one sublane group: make the (tS, D) block equal
        # pe's full dims so the (8,128) block rule is satisfied.
        pe = pe[:S, :]

    n_s = pl.cdiv(S, tS)
    # Sequence OUTER, batch INNER: the pe block index is constant across the
    # inner batch loop, so Pallas does not re-fetch the same pe tile B times.
    grid = (n_s, B)

    # VMEM budget: 3 streams (x, out, pe) x 2 buffers + headroom, capped at
    # 32 MiB so it fits v7x's 64 MiB VMEM (and v5e's 16 MiB scoped default is
    # explicitly overridden).
    block_bytes = tS * D * itemsize
    vmem_limit = int(min(32 * _MIB,
                         max(16 * _MIB, 6 * block_bytes + 4 * _MIB)))

    return pl.pallas_call(
        _pe_add_kernel,
        out_shape=jax.ShapeDtypeStruct((B, S, D), x.dtype),
        grid_spec=pltpu.PrefetchScalarGridSpec(
            num_scalar_prefetch=0,
            grid=grid,
            in_specs=[
                # x: one (tS, D) sequence tile of one batch element per step;
                # leading None squeezes the batch dim out of the kernel ref.
                pl.BlockSpec((None, tS, D), lambda s, b: (b, s, 0)),
                # pe: (tS, D) slice of the full buffer, shared by every batch
                # element (block index independent of b -> fetched once per s).
                pl.BlockSpec((tS, D), lambda s, b: (s, 0)),
            ],
            out_specs=pl.BlockSpec((None, tS, D), lambda s, b: (b, s, 0)),
        ),
        compiler_params=pltpu.CompilerParams(
            dimension_semantics=("parallel", "parallel"),
            vmem_limit_bytes=vmem_limit),
        cost_estimate=pl.CostEstimate(
            flops=B * S * D,
            transcendentals=0,
            # x read + out write + pe read once (not once per batch element).
            bytes_accessed=(2 * B * S * D + S * D) * itemsize),
    )(x, pe)


if __name__ == "__main__":
    MAX_LEN = 64
    B, S, D = 2, 16, 128   # D multiple of 128 -> lane-dense, unmasked stores

    key = jax.random.PRNGKey(0)
    x_f32 = jax.random.normal(key, (B, S, D), dtype=jnp.float32)

    # pe built once at init, in the model dtype (no per-call cast on hot path).
    pe_f32 = make_positional_encoding(D, max_len=MAX_LEN, dtype=jnp.float32)
    pe_bf16 = make_positional_encoding(D, max_len=MAX_LEN, dtype=jnp.bfloat16)

    # f32 path
    out_f32 = jax.block_until_ready(positional_encoding_forward(x_f32, pe_f32))
    ref_f32 = x_f32 + pe_f32[None, :S, :]
    assert out_f32.shape == (B, S, D)
    assert jnp.allclose(out_f32, ref_f32, atol=1e-6), "f32 mismatch vs reference"

    # bf16 path (add stays in bf16; pe buffer already bf16 from init)
    x_bf16 = x_f32.astype(jnp.bfloat16)
    out_bf16 = jax.block_until_ready(positional_encoding_forward(x_bf16, pe_bf16))
    ref_bf16 = x_bf16 + pe_bf16[None, :S, :]
    assert out_bf16.dtype == jnp.bfloat16
    assert jnp.allclose(out_bf16.astype(jnp.float32),
                        ref_bf16.astype(jnp.float32), atol=1e-2), \
        "bf16 mismatch vs reference"

    print("KERNEL_OK")
</pallas_src>

<mosaic_0001>
module attributes {stable_mosaic.version = 11 : i64} {
  func.func @_pe_add_kernel(%arg0: i32, %arg1: i32, %arg2: memref<1x16x128xf32, #tpu.memory_space<vmem>>, %arg3: memref<16x128xf32, #tpu.memory_space<vmem>>, %arg4: memref<1x16x128xf32, #tpu.memory_space<vmem>>) attributes {dimension_semantics = [#tpu.dimension_semantics<parallel>, #tpu.dimension_semantics<parallel>], iteration_bounds = array<i64: 1, 2>, scalar_prefetch = 0 : i64, scratch_operands = 0 : i64, tpu.core_type = #tpu.core_type<tc>, window_params = [{transform_indices = @transform_0, window_bounds = array<i64: 1, 16, 128>}, {transform_indices = @transform_1, window_bounds = array<i64: 16, 128>}, {transform_indices = @transform_2, window_bounds = array<i64: 1, 16, 128>}]} {
    %c0 = arith.constant 0 : index
    %c0_0 = arith.constant 0 : index
    %c0_1 = arith.constant 0 : index
    %0 = vector.load %arg2[%c0, %c0_0, %c0_1] : memref<1x16x128xf32, #tpu.memory_space<vmem>>, vector<1x16x128xf32>
    %1 = vector.shape_cast %0 : vector<1x16x128xf32> to vector<16x128xf32>
    %c0_2 = arith.constant 0 : index
    %c0_3 = arith.constant 0 : index
    %2 = vector.load %arg3[%c0_2, %c0_3] : memref<16x128xf32, #tpu.memory_space<vmem>>, vector<16x128xf32>
    %3 = arith.addf %1, %2 : vector<16x128xf32>
    %c0_4 = arith.constant 0 : index
    %c0_5 = arith.constant 0 : index
    %c0_6 = arith.constant 0 : index
    %4 = vector.load %arg4[%c0_4, %c0_5, %c0_6] : memref<1x16x128xf32, #tpu.memory_space<vmem>>, vector<1x16x128xf32>
    %5 = vector.shape_cast %4 : vector<1x16x128xf32> to vector<16x128xf32>
    %6 = vector.shape_cast %3 : vector<16x128xf32> to vector<1x16x128xf32>
    tpu.vector_store %arg4[%c0_4, %c0_5, %c0_6], %6 {strides = array<i32>} : memref<1x16x128xf32, #tpu.memory_space<vmem>>, vector<1x16x128xf32>,
    return
  }
  func.func @transform_0(%arg0: i32, %arg1: i32) -> (i32, i32, i32) {
    %c0_i32 = arith.constant 0 : i32
    %c0_i32_0 = arith.constant 0 : i32
    return %arg1, %arg0, %c0_i32 : i32, i32, i32
  }
  func.func @transform_1(%arg0: i32, %arg1: i32) -> (i32, i32) {
    %c0_i32 = arith.constant 0 : i32
    %c0_i32_0 = arith.constant 0 : i32
    return %arg0, %c0_i32 : i32, i32
  }
  func.func @transform_2(%arg0: i32, %arg1: i32) -> (i32, i32, i32) {
    %c0_i32 = arith.constant 0 : i32
    %c0_i32_0 = arith.constant 0 : i32
    return %arg1, %arg0, %c0_i32 : i32, i32, i32
  }
}

</mosaic_0001>

<bundles_post_ra>
// kernel: tpu_custom_call.1
= control target key start
LH: loop header
LB: loop body
LE: loop exit
PB: predicated region body
PF: predicated region fallthrough
CT: control target
= control target key end

     0   :  { %7 = vsyncpa [#allocation3], 0  ;;  %s774_s0 = inlined_call_operand.hbm [shape: f32[2,16,128], index: 0, kind: input, shape index: {}]   ;;  %s775_s1 = inlined_call_operand.hbm [shape: f32[64,128], index: 1, kind: input, shape index: {}]   ;;  %s776_s2 = inlined_call_operand.hbm [shape: f32[2,16,128], index: 2, kind: output, shape index: {}]  }
   0x1   :  { %9 = vsyncpa [#allocation3 + $0x1], 0 }
   0x2   :  { %10 = vsyncpa [#allocation6], 0 }
   0x3   :  { %11 = vsyncpa [#allocation4], 0 }
   0x4   :  { %13 = vsyncpa [#allocation4 + $0x1], 0  ;;  %s587_s9 = smov 0   ;;  %s589_s10 = smov 0  }
   0x5   :  { %s591_s11 = smov 0   ;;  %s593_s12 = smov 0  }
   0x6   :  { %s595_s13 = smov 0   ;;  %s597_s14 = smov 0  }
   0x7 LB: > { %s329_s15 = sadd.s32 4294967295, %s563_s14   ;;  %s330_s16 = sadd.s32 4294967294, %s563_s14   ;;  %s563_s14 = sphi %s597_s14, %s19_s14   ;;  %s559_s13 = sphi %s595_s13, %s796_s13   ;;  %s555_s12 = sphi %s593_s12, %s795_s12   ;;  %s551_s11 = sphi %s591_s11, %s794_s11   ;;  %s547_s10 = sphi %s589_s10, %s793_s10   ;;  %s543_s9 = sphi %s587_s9, %s792_s9  }
   0x8   : > { %p53_p0 = scmp.ne.s32.totalorder %s547_s10, %s543_s9  ;;  %p621_p1 = scmp.eq.s32.totalorder %s329_s15, 0 }
   0x9   : > { %p625_p2 = scmp.eq.s32.totalorder %s329_s15, 1  ;;  %p111_p3 = scmp.eq.s32.totalorder %s330_s16, 1 }
   0xa   : > { %p631_p4 = por %p621_p1, %p53_p0  ;;  %p331_p5 = scmp.ge.s32.totalorder %s563_s14, 1 }
   0xb   : > { %p636_p6 = por %p111_p3, %p53_p0  ;;  %p118_p7 = scmp.lt.s32.totalorder %s563_s14, 3 }
   0xc   : > { %s781_s19 = scalar_select %p631_p4, 1, 0 }
   0xd   : > { %s782_s20 = scalar_select %p636_p6, 1, 0 }
   0xe   : > { %p641_p8 = pnand %p331_p5, %p118_p7  ;;  %s565_s22 = smov [#allocation5]  }
   0xf   : > { %s133_s23 = sshll.u32 %s565_s22, 4  ;;  %s28_s25 = sadd.s32 1, %s559_s13  ;;  %s134_s23 = int_to_ptr.vmem [resolvable:$true] %s133_s23 }
  0x10   : > { %p356_p9 = pneg %p641_p8  ;;  %s436_s26 = scalar_lea.vmem %s134_s23, 256 }
  0x11   : > { %p437_p13 = scmp.ne.s32.totalorder %s134_s23, %s436_s26  ;;  %p444_p5 = scmp.lt.s32.totalorder %s134_s23, %s134_s23 }
  0x12   : > { %p650_p11 = pnand %p356_p9, %p621_p1  ;;  %p445_p7 = scmp.lt.s32.totalorder %s436_s26, %s436_s26 }
  0x14   : > { %p427_p12 = pneg %p650_p11  ;;  %p446_p6 = por %p445_p7, %p444_p5 }
  0x16   : > { %p439_p0 = pnand %p437_p13, %p427_p12 }
  0x18   : > { %p440_p3 = pneg %p439_p0 }
  0x1a   : > { %p447_p4 = pnand %p446_p6, %p440_p3 }
  0x1c   : > { %450 = shalt.err (!%p447_p4)
}
  0x1d   : > { %s778_s27 = smov 128   ;;  %s567_s28 = smov 8  }
  0x1e   : > { %359 = dma.hbm_to_vmem [thread:$0]  (!%p650_p11), %s775_s1, 256, %s134_s23, [#allocation6], %s778_s27, %s778_s27, %s567_s28  }
  0x1f   : > { %p29_p4 = scmp.ge.s32.totalorder %s28_s25, 2  ;;  %s40_s3 = sadd.s32 1, %s551_s11 }
  0x20   : > { %p47_p6 = scmp.ne.s32.totalorder %s551_s11, %s547_s10  ;;  %p48_p9 = scmp.eq.s32.totalorder %s563_s14, 0 }
  0x21   : > { %s798_s25 = smov (%p29_p4, %s28_s25), 0  ;;  %p369_p0 = scmp.lt.s32.totalorder %s563_s14, 2 }
  0x22   : > { %p671_p12 = por %p48_p9, %p47_p6  ;;  %p677_p13 = por %p625_p2, %p47_p6 }
  0x23   : > { %s35_s6 = ssub.s32 %s559_s13, %s798_s25  ;;  %s147_s7 = sand.u32 1, %s551_s11  }
  0x24   : > { %p38_p11 = scmp.eq.s32.totalorder %s35_s6, 0  ;;  %s334_s8 = sshll.u32 %s147_s7, 4 }
  0x25   : > { %s346_s16 = sshll.u32 %s559_s13, 8  ;;  %s151_s26 = scalar_lea.vmem [#allocation2], %s334_s8 }
  0x26   : > { %s686_s15 = scalar_select %p38_p11, %s551_s11, %s40_s3  }
  0x27   : > { %s159_s24 = scalar_lea.hbm %s774_s0, %s346_s16  ;;  %s160_s29 = sshll.u32 %s151_s26, 4  ;;  %s161_s29 = int_to_ptr.vmem [resolvable:$true] %s160_s29 }
  0x28   : > { %p694_p2 = pnand %p369_p0, %p671_p12  ;;  %s148_s30 = scalar_lea.sflag [#allocation3], %s147_s7 }
  0x29   : > { %s464_s6 = scalar_lea.vmem %s161_s29, 256  ;;  %s568_s3 = smov [#allocation2]  }
  0x2a   : > { %p453_p3 = pneg %p694_p2  ;;  %p465_p5 = scmp.ne.s32.totalorder %s161_s29, %s464_s6 }
  0x2b   : > { %s469_s27 = sshll.u32 %s568_s3, 4  ;;  %s470_s27 = int_to_ptr.vmem [resolvable:$false] %s469_s27 }
  0x2c   : > { %p467_p7 = pnand %p465_p5, %p453_p3  ;;  %s471_s16 = scalar_lea.vmem %s470_s27, 512 }
  0x2d   : > { %p472_p6 = scmp.lt.s32.totalorder %s161_s29, %s470_s27  ;;  %p473_p9 = scmp.lt.s32.totalorder %s471_s16, %s464_s6 }
  0x2e   : > { %p468_p4 = pneg %p467_p7 }
  0x2f   : > { %p474_p11 = por %p473_p9, %p472_p6 }
  0x31   : > { %p475_p10 = pnand %p474_p11, %p468_p4 }
  0x33   : > { %478 = shalt.err (!%p475_p10)
}
  0x34   : > { %s788_s4 = smov 128   ;;  %172 = sbr.rel (%p641_p8) target bundleno = 85 (0x55), region = 28 }
  0x35   : > { %363 = dma.hbm_to_vmem [thread:$0]  (!%p694_p2), %s159_s24, 256, %s161_s29, %s148_s30, %s788_s4, %s788_s4, %s567_s28  }
  0x36   : > { %s708_s7 = sand.u32 (!%p641_p8), 1, %s547_s10   ;;  %p789_p12 = scmp.ne.s32.totalorder (!%p641_p8), %s781_s19, 0 }
  0x37   : > { %s338_s27 = sshll.u32 (!%p641_p8), %s708_s7, 4  ;;  %s175_s8 = scalar_lea.sflag (!%p641_p8), [#allocation3], %s708_s7 }
  0x38   : > { %s178_s22 = scalar_lea.vmem (!%p641_p8), [#allocation2], %s338_s27 }
  0x39   : > { %530 = dma.done.wait (%p789_p12), %s175_s8, 256  }
  0x3a   : > { %532 = vsyncadd (%p789_p12), %s175_s8, 4294967040 }
  0x3b   : > { %534 = dma.done.wait (%p621_p1), [#allocation6], 256  }
  0x3c   : > { %536 = vsyncadd (%p621_p1), [#allocation6], 4294967040  ;;  %s202_s21 = scalar_lea.vmem [#allocation7], %s338_s27  ;;  %s347_s23 = sshll.u32 %s555_s12, 8  ;;  %v206_v0 = vld [vmem:[%s178_s22] sm:$0xff]  ;;  %v207_v2 = vld [vmem:[%s178_s22 + $0x8] sm:$0xff] }
  0x3d   : > { %s230_s28 = sshll.u32 %s202_s21, 4  ;;  %v208_v1 = vld [vmem:[#allocation5] sm:$0xff]  ;;  %v209_v4 = vld [vmem:[#allocation5 + $0x8] sm:$0xff]  ;;  %s726_s17 = scalar_lea.hbm %s776_s2, %s347_s23  ;;  %s721_s28 = int_to_ptr.vmem [resolvable:$true] %s230_s28 }
  0x3e   : > { %v210_v3 = vadd.f32 %v208_v1, %v206_v0  ;;  %v211_v5 = vadd.f32 %v209_v4, %v207_v2  ;;  %s215_s26 = scalar_lea.sflag [#allocation4], %s708_s7  ;;  %s479_s12 = scalar_lea.vmem %s721_s28, 256 }
  0x3f   : > { %p480_p1 = scmp.ne.s32.totalorder %s721_s28, %s479_s12  ;;  %s569_s29 = smov [#allocation7]  }
  0x40   : > { %212 = vst [vmem:[%s202_s21] sm:$0xff] %v210_v3  ;;  %213 = vst [vmem:[%s202_s21 + $0x8] sm:$0xff] %v211_v5  ;;  %s483_s18 = sshll.u32 %s569_s29, 4  ;;  %s484_s18 = int_to_ptr.vmem [resolvable:$false] %s483_s18 }
  0x41   : > { %p481_p8 = pnand %p480_p1, %p677_p13  ;;  %s485_s30 = scalar_lea.vmem %s484_s18, 512 }
  0x42   : > { %p486_p0 = scmp.lt.s32.totalorder %s721_s28, %s484_s18  ;;  %p487_p2 = scmp.lt.s32.totalorder %s485_s30, %s479_s12 }
  0x43   : > { %p482_p10 = pneg %p481_p8 }
  0x44   : > { %p488_p3 = por %p487_p2, %p486_p0 }
  0x46   : > { %p489_p5 = pnand %p488_p3, %p482_p10 }
  0x48   : > { %492 = shalt.err (!%p489_p5)
}
  0x49   : > { %s493_s6 = scalar_lea.hbm %s726_s17, 256  ;;  %s497_s4 = scalar_lea.hbm %s776_s2, 512 }
  0x4a   : > { %p494_p7 = scmp.ne.s32.totalorder %s726_s17, %s493_s6  ;;  %p498_p9 = scmp.lt.s32.totalorder %s726_s17, %s776_s2 }
  0x4b   : > { %p499_p11 = scmp.lt.s32.totalorder %s497_s4, %s493_s6 }
  0x4c   : > { %p495_p4 = pnand %p494_p7, %p677_p13 }
  0x4d   : > { %p500_p12 = por %p499_p11, %p498_p9 }
  0x4e   : > { %p496_p6 = pneg %p495_p4 }
  0x50   : > { %p501_p1 = pnand %p500_p12, %p496_p6 }
  0x52   : > { %504 = shalt.err (!%p501_p1)
}
  0x53   : > { %s570_s22 = smov 128   ;;  %s571_s21 = smov 8  }
  0x54   : > { %354 = dma.vmem_to_hbm [thread:$0]  (%p677_p13), %s721_s28, 256, %s726_s17, %s215_s26, %s570_s22, %s570_s22, %s571_s21  }
  0x55 PF: > { %s245_s23 = sand.u32 1, %s543_s9   ;;  %p790_p8 = scmp.ne.s32.totalorder %s782_s20, 0 }
  0x56   : > { %p791_p10 = scmp.ge.s32.totalorder %s563_s14, 2  ;;  %s246_s19 = scalar_lea.sflag [#allocation4], %s245_s23 }
  0x58   : > { %p365_p0 = pnand %p791_p10, %p790_p8 }
  0x5a   : > { %p366_p2 = pneg %p365_p0 }
  0x5c   : > { %538 = dma.done.wait (%p366_p2), %s246_s19, 256  }
  0x5d   : > { %540 = vsyncadd (%p366_p2), %s246_s19, 4294967040  ;;  %s19_s14 = sadd.s32 1, %s563_s14   ;;  %s792_s9 = smov %s547_s10 }
  0x5e   : > { %p16_p3 = scmp.ge.s32.totalorder %s19_s14, 4   ;;  %s793_s10 = smov %s551_s11 }
  0x5f   : > { %s794_s11 = smov %s686_s15  ;;  %s795_s12 = smov %s559_s13 }
  0x60   : > { %s796_s13 = smov %s798_s25  ;;  %18 = sbr.rel (!%p16_p3) target bundleno = 7 (0x7), region = 78 }
  0x65   :  { %251 = vsyncpa [#allocation3], 1 }
  0x66   :  { %253 = vsyncpa [#allocation3 + $0x1], 1 }
  0x67   :  { %254 = vsyncpa [#allocation6], 1 }
  0x68   :  { %255 = vsyncpa [#allocation4], 1 }
  0x69   :  { %257 = vsyncpa [#allocation4 + $0x1], 1 }

</bundles_post_ra>
